<compile_context>
chip_gen: v5e
topology: v5e:2x2
jax: 0.10.0
libtpu: 0.0.40
codegen_flags: <defaults>
</compile_context>

<pallas_src>
import functools
import math

import jax
import jax.numpy as jnp
from jax.experimental import pallas as pl
from jax.experimental.pallas import tpu as pltpu


_NEG_INF = -1000000000.0       # plain Python float: matches torch masked_fill_(-1e9)


# ---------------------------------------------------------------------------
# Kernels
# ---------------------------------------------------------------------------
def _sdpa_kernel(q_ref, k_ref, v_ref, m_ref, ctx_ref, attn_ref, *, scale):
    """One (batch, head-group, q-tile) grid step; full Lk resident.

    q_ref    : (1, G,  Lq_t, d_k)  compute dtype
    k_ref    : (1, G,  Lk,   d_k)
    v_ref    : (1, G,  Lk,   d_v)
    m_ref    : (1, Gm, Lq_t, Lk)   bool/int8, Gm in {1, G}; nonzero == masked
    ctx_ref  : (1, G,  Lq_t, d_v)
    attn_ref : (1, G,  Lq_t, Lk)
    """
    q = q_ref[0]
    k = k_ref[0]
    v = v_ref[0]
    masked = m_ref[0] != 0

    # scores[g,q,k] = sum_d q[g,q,d] * k[g,k,d]: contracts K on its last axis
    # directly (no XLU transpose); MXU matmul with f32 accumulation.
    scores = jnp.einsum("gqd,gkd->gqk", q, k, preferred_element_type=jnp.float32)
    scores = scores * scale                       # f32 VPU, hidden under the MXU
    scores = jnp.where(masked, _NEG_INF, scores)  # masked_fill_(attn_mask, -1e9)

    # Numerically-stable softmax over keys (f32). Exact normalization so the
    # returned attention rows sum to 1.
    row_max = jnp.max(scores, axis=-1, keepdims=True)
    e = jnp.exp(scores - row_max)
    denom = jnp.sum(e, axis=-1, keepdims=True)
    attn = e * (1.0 / denom)

    # context = attn @ V (probabilities fed to the MXU in the compute dtype).
    ctx = jnp.einsum("gqk,gkd->gqd", attn.astype(v.dtype), v,
                     preferred_element_type=jnp.float32)

    attn_ref[0] = attn.astype(attn_ref.dtype)
    ctx_ref[0] = ctx.astype(ctx_ref.dtype)


def _sdpa_flash_kernel(q_ref, k_ref, v_ref, m_ref, ctx_ref,
                       m_sc, l_sc, acc_sc, *, scale):
    """Flash-style step: Lk tiled on the trailing ("arbitrary") grid axis,
    online softmax in VMEM scratch, no attention-matrix writeback.

    q_ref   : (1, G,  Lq_t, d_k)    k_ref/v_ref : (1, G, Lk_t, d_k/d_v)
    m_ref   : (1, Gm, Lq_t, Lk_t)   ctx_ref     : (1, G, Lq_t, d_v)
    m_sc/l_sc : (G, Lq_t, 1) f32    acc_sc      : (G, Lq_t, d_v) f32
    """
    kv = pl.program_id(3)

    @pl.when(kv == 0)
    def _():
        m_sc[...] = jnp.full(m_sc.shape, -jnp.inf, dtype=m_sc.dtype)
        l_sc[...] = jnp.zeros(l_sc.shape, dtype=l_sc.dtype)
        acc_sc[...] = jnp.zeros(acc_sc.shape, dtype=acc_sc.dtype)

    q = q_ref[0]
    k = k_ref[0]
    v = v_ref[0]
    masked = m_ref[0] != 0

    s = jnp.einsum("gqd,gkd->gqk", q, k, preferred_element_type=jnp.float32)
    s = s * scale
    s = jnp.where(masked, _NEG_INF, s)

    m_prev = m_sc[...]
    m_new = jnp.maximum(m_prev, jnp.max(s, axis=-1, keepdims=True))
    alpha = jnp.exp(m_prev - m_new)
    p = jnp.exp(s - m_new)
    l_sc[...] = alpha * l_sc[...] + jnp.sum(p, axis=-1, keepdims=True)
    acc_sc[...] = alpha * acc_sc[...] + jnp.einsum(
        "gqk,gkd->gqd", p.astype(v.dtype), v, preferred_element_type=jnp.float32)
    m_sc[...] = m_new

    @pl.when(kv == pl.num_programs(3) - 1)
    def _():
        ctx_ref[0] = (acc_sc[...] * (1.0 / l_sc[...])).astype(ctx_ref.dtype)


# ---------------------------------------------------------------------------
# Tiling / VMEM sizing helpers
# ---------------------------------------------------------------------------
def _vmem_sizes():
    """(tile budget, vmem_limit_bytes) derived from the chip's VMEM capacity."""
    cap = 64 * 1024 * 1024                       # conservative default (v7x)
    try:
        info = pltpu.get_tpu_info()
        cap = int(getattr(info, "vmem_capacity_bytes", cap)) or cap
    except Exception:
        pass
    budget = int(cap * 0.45)                     # headroom for compiler scratch
    limit = max(min(int(cap * 0.75), 100 * 1024 * 1024), 32 * 1024 * 1024)
    return budget, limit


def _step_vmem_bytes(g, gm, lq_t, lk, dk, dv, cbytes, obytes, abytes, scratch_f32):
    """Per-grid-step VMEM footprint (double-buffered tiles + live intermediates)."""
    in_b = g * (lq_t * dk + lk * (dk + dv)) * cbytes + gm * lq_t * lk   # mask: 1 B/elem
    out_b = g * lq_t * (dv * obytes + lk * abytes)
    # ~4 score-sized f32 live buffers: scores, masked scores, exp, f32 attn/p.
    live = 4 * g * lq_t * lk * 4
    return 2 * (in_b + out_b) + live + scratch_f32 * 4


def _lq_candidates(Lq, max_rows=256):
    """Lq tile candidates, best first: full (if small), then multiples of 16, then 8."""
    cands = []
    if Lq <= max_rows:
        cands.append(Lq)
    for step in (16, 8):
        for d in range(min(max_rows, Lq), step - 1, -step):
            if Lq % d == 0 and d % step == 0 and d not in cands:
                cands.append(d)
    if not cands:
        cands.append(Lq)                         # awkward Lq: full tile fallback
    return cands


def _pick_lk_tile(Lk, max_cols=1024):
    """Lk tile for the flash path: multiple of 128 (lane-dense) or full Lk."""
    if Lk <= max_cols:
        return Lk
    best = None
    for d in range(128, max_cols + 1, 128):
        if Lk % d == 0:
            best = d
    return best if best is not None else Lk


# ---------------------------------------------------------------------------
# Wrapper
# ---------------------------------------------------------------------------
def scaled_dot_product_attention(Q, K, V, attn_mask, d_k, *,
                                 compute_dtype=jnp.bfloat16,
                                 attn_dtype=None,
                                 return_attn=True):
    """Pallas TPU implementation of ScaledDotProductAttention.forward.

    Q: [B,H,Lq,d_k]; K: [B,H,Lk,d_k]; V: [B,H,Lk,d_v];
    attn_mask: [B,H,Lq,Lk] or [B,1,Lq,Lk] (nonzero == masked).
    Returns (context [B,H,Lq,d_v], attn [B,H,Lq,Lk] or None if return_attn=False).

    compute_dtype: dtype Q/K/V are streamed & matmul'd in (bf16 halves HBM traffic
      and doubles MXU throughput; softmax math is always f32). Use jnp.float32
      for bit-accurate parity with the PyTorch module.
    attn_dtype: dtype of the returned attention matrix. Defaults to bf16 on the
      bf16 compute path (halves the dominant HBM writeback) and Q.dtype on the
      f32 path.
    return_attn: when False, uses a flash-style kernel (Lk tiled, online softmax)
      that never materializes the attention matrix — the biggest win when the
      caller only needs the context.

    Note: fully-masked rows produce a uniform 1/Lk distribution (all scores are
    -1e9), matching PyTorch's masked_fill + softmax behaviour.
    """
    B, H, Lq, dk = Q.shape
    Lk = K.shape[2]
    dv = V.shape[3]

    out_dtype = Q.dtype
    cbytes = jnp.dtype(compute_dtype).itemsize
    obytes = jnp.dtype(out_dtype).itemsize
    if attn_dtype is None:
        attn_dtype = jnp.bfloat16 if cbytes < 4 else out_dtype
    abytes = jnp.dtype(attn_dtype).itemsize

    if attn_mask.ndim != 4 or attn_mask.shape[1] not in (1, H):
        raise ValueError("attn_mask must be [B, H, Lq, Lk] or [B, 1, Lq, Lk]")
    Hm = attn_mask.shape[1]
    mask_shared = Hm == 1
    # Pass bool/int8 masks through untouched (no host-side broadcast/astype pass);
    # anything wider is narrowed to int8 (4x less DMA than int32).
    if attn_mask.dtype in (jnp.bool_, jnp.int8):
        m = attn_mask
    else:
        m = attn_mask.astype(jnp.int8)

    q = Q.astype(compute_dtype)
    k = K.astype(compute_dtype)
    v = V.astype(compute_dtype)

    scale = 1.0 / math.sqrt(d_k)
    budget, vmem_limit = _vmem_sizes()

    if return_attn:
        lk_blk = Lk
        a_b = abytes
        flash_scratch = 0
    else:
        lk_blk = _pick_lk_tile(Lk)
        a_b = 0
        flash_scratch = 1                        # flag: account scratch below

    def step_bytes(g, lq):
        gm = 1 if mask_shared else g
        scratch = g * lq * (dv + 2) if flash_scratch else 0
        return _step_vmem_bytes(g, gm, lq, lk_blk, dk, dv, cbytes, obytes, a_b, scratch)

    # Lq tile: re-validated against the budget even at G == 1.
    lq_cands = _lq_candidates(Lq)
    lq_t = None
    for cand in lq_cands:
        if step_bytes(1, cand) <= budget:
            lq_t = cand
            break
    if lq_t is None:
        lq_t = lq_cands[-1]                      # smallest option; may still be tight

    # Head group: largest divisor of H whose per-step tiles fit the budget.
    G = 1
    for g in range(H, 0, -1):
        if H % g == 0 and step_bytes(g, lq_t) <= budget:
            G = g
            break

    # v7x megacore: make sure the parallel grid has >= 2 steps when possible.
    if B * (H // G) * (Lq // lq_t) < 2 and H > 1 and H // G == 1:
        for g in range(H // 2, 0, -1):
            if H % g == 0:
                G = g
                break
    Gm = 1 if mask_shared else G

    if return_attn:
        kernel = functools.partial(_sdpa_kernel, scale=scale)
        grid = (B, H // G, Lq // lq_t)
        ctx, attn = pl.pallas_call(
            kernel,
            out_shape=(
                jax.ShapeDtypeStruct((B, H, Lq, dv), out_dtype),
                jax.ShapeDtypeStruct((B, H, Lq, Lk), attn_dtype),
            ),
            grid_spec=pltpu.PrefetchScalarGridSpec(
                num_scalar_prefetch=0,
                grid=grid,
                in_specs=[
                    pl.BlockSpec((1, G, lq_t, dk), lambda b, h, qi: (b, h, qi, 0)),
                    pl.BlockSpec((1, G, Lk, dk), lambda b, h, qi: (b, h, 0, 0)),
                    pl.BlockSpec((1, G, Lk, dv), lambda b, h, qi: (b, h, 0, 0)),
                    pl.BlockSpec((1, Gm, lq_t, Lk),
                                 (lambda b, h, qi: (b, 0, qi, 0)) if mask_shared
                                 else (lambda b, h, qi: (b, h, qi, 0))),
                ],
                out_specs=[
                    pl.BlockSpec((1, G, lq_t, dv), lambda b, h, qi: (b, h, qi, 0)),
                    pl.BlockSpec((1, G, lq_t, Lk), lambda b, h, qi: (b, h, qi, 0)),
                ],
            ),
            compiler_params=pltpu.CompilerParams(
                # No cross-step accumulation anywhere: all axes are parallel
                # (lets v7x megacore shard batch, head-group and q-tile axes).
                dimension_semantics=("parallel", "parallel", "parallel"),
                vmem_limit_bytes=vmem_limit,
            ),
        )(q, k, v, m)
        return ctx, attn

    # Flash path: no attention-matrix output; Lk tiled on the trailing axis.
    kernel = functools.partial(_sdpa_flash_kernel, scale=scale)
    grid = (B, H // G, Lq // lq_t, Lk // lk_blk)
    ctx = pl.pallas_call(
        kernel,
        out_shape=jax.ShapeDtypeStruct((B, H, Lq, dv), out_dtype),
        grid_spec=pltpu.PrefetchScalarGridSpec(
            num_scalar_prefetch=0,
            grid=grid,
            in_specs=[
                pl.BlockSpec((1, G, lq_t, dk), lambda b, h, qi, ki: (b, h, qi, 0)),
                pl.BlockSpec((1, G, lk_blk, dk), lambda b, h, qi, ki: (b, h, ki, 0)),
                pl.BlockSpec((1, G, lk_blk, dv), lambda b, h, qi, ki: (b, h, ki, 0)),
                pl.BlockSpec((1, Gm, lq_t, lk_blk),
                             (lambda b, h, qi, ki: (b, 0, qi, ki)) if mask_shared
                             else (lambda b, h, qi, ki: (b, h, qi, ki))),
            ],
            out_specs=pl.BlockSpec((1, G, lq_t, dv),
                                   lambda b, h, qi, ki: (b, h, qi, 0)),
            scratch_shapes=[
                pltpu.VMEM((G, lq_t, 1), jnp.float32),    # running max
                pltpu.VMEM((G, lq_t, 1), jnp.float32),    # running denom
                pltpu.VMEM((G, lq_t, dv), jnp.float32),   # running context acc
            ],
        ),
        compiler_params=pltpu.CompilerParams(
            dimension_semantics=("parallel", "parallel", "parallel", "arbitrary"),
            vmem_limit_bytes=vmem_limit,
        ),
    )(q, k, v, m)
    return ctx, None


# ---------------------------------------------------------------------------
# Reference + self-test
# ---------------------------------------------------------------------------
def _reference(Q, K, V, attn_mask, d_k):
    scores = jnp.matmul(Q, jnp.swapaxes(K, -1, -2)) / math.sqrt(d_k)
    scores = jnp.where(attn_mask, _NEG_INF, scores)
    attn = jax.nn.softmax(scores, axis=-1)
    context = jnp.matmul(attn, V)
    return context, attn


if __name__ == "__main__":
    key = jax.random.PRNGKey(0)
    B, H, Lq, Lk, d_k, d_v = 2, 2, 8, 8, 32, 32

    kq, kk, kv, km = jax.random.split(key, 4)
    Q = jax.random.normal(kq, (B, H, Lq, d_k), dtype=jnp.float32)
    K = jax.random.normal(kk, (B, H, Lk, d_k), dtype=jnp.float32)
    V = jax.random.normal(kv, (B, H, Lk, d_v), dtype=jnp.float32)
    attn_mask = jax.random.bernoulli(km, p=0.25, shape=(B, H, Lq, Lk))
    attn_mask = attn_mask.at[..., 0].set(False)   # no fully-masked rows

    ref_ctx, ref_attn = _reference(Q, K, V, attn_mask, d_k)

    # 1) Exact-semantics path (f32 compute) -- parity with the PyTorch module.
    ctx32, attn32 = scaled_dot_product_attention(
        Q, K, V, attn_mask, d_k, compute_dtype=jnp.float32)
    jax.block_until_ready((ctx32, attn32))
    assert jnp.allclose(ctx32, ref_ctx, atol=1e-4, rtol=1e-4)
    assert jnp.allclose(attn32, ref_attn, atol=1e-4, rtol=1e-4)

    # 2) Default fast path (bf16 Q/K/V through DMA + MXU, f32 softmax, bf16 attn out).
    ctx, attn = scaled_dot_product_attention(Q, K, V, attn_mask, d_k)
    jax.block_until_ready((ctx, attn))
    assert ctx.shape == (B, H, Lq, d_v) and attn.shape == (B, H, Lq, Lk)
    assert jnp.allclose(ctx, ref_ctx, atol=7.5e-2, rtol=7.5e-2)
    assert jnp.allclose(attn, ref_attn, atol=3e-2, rtol=3e-2)

    # 3) Head-broadcast mask path ([B,1,Lq,Lk]): mask DMA'd once per (batch, q-tile).
    bmask = attn_mask[:, :1]
    ref_ctx_b, ref_attn_b = _reference(Q, K, V, bmask, d_k)
    ctx_b, attn_b = scaled_dot_product_attention(Q, K, V, bmask, d_k)
    jax.block_until_ready((ctx_b, attn_b))
    assert jnp.allclose(ctx_b, ref_ctx_b, atol=7.5e-2, rtol=7.5e-2)
    assert jnp.allclose(attn_b, ref_attn_b, atol=3e-2, rtol=3e-2)

    # 4) Flash path (context only, no attention-matrix writeback).
    ctx_f, attn_none = scaled_dot_product_attention(
        Q, K, V, attn_mask, d_k, return_attn=False)
    jax.block_until_ready(ctx_f)
    assert attn_none is None
    assert ctx_f.shape == (B, H, Lq, d_v)
    assert jnp.allclose(ctx_f, ref_ctx, atol=7.5e-2, rtol=7.5e-2)

    print("KERNEL_OK")
</pallas_src>

<mosaic_0001>
module attributes {stable_mosaic.version = 11 : i64} {
  func.func @_sdpa_kernel(%arg0: i32, %arg1: i32, %arg2: i32, %arg3: memref<1x2x8x32xf32, #tpu.memory_space<vmem>>, %arg4: memref<1x2x8x32xf32, #tpu.memory_space<vmem>>, %arg5: memref<1x2x8x32xf32, #tpu.memory_space<vmem>>, %arg6: memref<1x2x8x8xi32, #tpu.memory_space<vmem>>, %arg7: memref<1x2x8x32xf32, #tpu.memory_space<vmem>>, %arg8: memref<1x2x8x8xf32, #tpu.memory_space<vmem>>) attributes {dimension_semantics = [#tpu.dimension_semantics<parallel>, #tpu.dimension_semantics<parallel>, #tpu.dimension_semantics<parallel>], iteration_bounds = array<i64: 2, 1, 1>, scalar_prefetch = 0 : i64, scratch_operands = 0 : i64, tpu.core_type = #tpu.core_type<tc>, window_params = [{transform_indices = @transform_0, window_bounds = array<i64: 1, 2, 8, 32>}, {transform_indices = @transform_1, window_bounds = array<i64: 1, 2, 8, 32>}, {transform_indices = @transform_2, window_bounds = array<i64: 1, 2, 8, 32>}, {transform_indices = @transform_3, window_bounds = array<i64: 1, 2, 8, 8>}, {transform_indices = @transform_4, window_bounds = array<i64: 1, 2, 8, 32>}, {transform_indices = @transform_5, window_bounds = array<i64: 1, 2, 8, 8>}]} {
    %c0 = arith.constant 0 : index
    %c0_0 = arith.constant 0 : index
    %c0_1 = arith.constant 0 : index
    %c0_2 = arith.constant 0 : index
    %0 = vector.load %arg3[%c0, %c0_0, %c0_1, %c0_2] : memref<1x2x8x32xf32, #tpu.memory_space<vmem>>, vector<1x2x8x32xf32>
    %1 = vector.shape_cast %0 : vector<1x2x8x32xf32> to vector<2x8x32xf32>
    %c0_3 = arith.constant 0 : index
    %c0_4 = arith.constant 0 : index
    %c0_5 = arith.constant 0 : index
    %c0_6 = arith.constant 0 : index
    %2 = vector.load %arg4[%c0_3, %c0_4, %c0_5, %c0_6] : memref<1x2x8x32xf32, #tpu.memory_space<vmem>>, vector<1x2x8x32xf32>
    %3 = vector.shape_cast %2 : vector<1x2x8x32xf32> to vector<2x8x32xf32>
    %c0_7 = arith.constant 0 : index
    %c0_8 = arith.constant 0 : index
    %c0_9 = arith.constant 0 : index
    %c0_10 = arith.constant 0 : index
    %4 = vector.load %arg5[%c0_7, %c0_8, %c0_9, %c0_10] : memref<1x2x8x32xf32, #tpu.memory_space<vmem>>, vector<1x2x8x32xf32>
    %5 = vector.shape_cast %4 : vector<1x2x8x32xf32> to vector<2x8x32xf32>
    %c0_11 = arith.constant 0 : index
    %c0_12 = arith.constant 0 : index
    %c0_13 = arith.constant 0 : index
    %c0_14 = arith.constant 0 : index
    %6 = vector.load %arg6[%c0_11, %c0_12, %c0_13, %c0_14] : memref<1x2x8x8xi32, #tpu.memory_space<vmem>>, vector<1x2x8x8xi32>
    %7 = vector.shape_cast %6 : vector<1x2x8x8xi32> to vector<2x8x8xi32>
    %cst = arith.constant dense<0> : vector<2x8x8xi32>
    %8 = arith.cmpi ne, %7, %cst : vector<2x8x8xi32>
    %9 = arith.extui %8 : vector<2x8x8xi1> to vector<2x8x8xi32>
    %c0_i32 = arith.constant 0 : i32
    %10 = vector.broadcast %c0_i32 : i32 to vector<2x8x8xi32>
    %11 = arith.cmpi ne, %9, %10 : vector<2x8x8xi32>
    "tpu.trace_start"() <{level = 10 : i32, message = "gqd,gkd->gqk"}> : () -> ()
    %cst_15 = arith.constant dense<0.000000e+00> : vector<2x8x8xf32>
    %12 = tpu.matmul %1, %3, %cst_15 {dimension_numbers = #tpu.dot_dimension_numbers<[2], [2], [1], [1], [0, 0, 0, 1, 1, 1], [0], [0]>} : vector<2x8x32xf32>, vector<2x8x32xf32>, vector<2x8x8xf32> -> vector<2x8x8xf32>
    "tpu.trace_stop"() : () -> ()
    %cst_16 = arith.constant 0.176776692 : f32
    %13 = vector.broadcast %cst_16 : f32 to vector<2x8x8xf32>
    %14 = arith.mulf %12, %13 : vector<2x8x8xf32>
    %cst_17 = arith.constant -1.000000e+09 : f32
    %15 = vector.broadcast %cst_17 : f32 to vector<2x8x8xf32>
    %16 = arith.select %11, %15, %14 : vector<2x8x8xi1>, vector<2x8x8xf32>
    %cst_18 = arith.constant dense<0xFF800000> : vector<2x8xf32>
    %17 = vector.multi_reduction <maximumf>, %16, %cst_18 [2] : vector<2x8x8xf32> to vector<2x8xf32>
    %18 = vector.shape_cast %17 : vector<2x8xf32> to vector<2x8x1xf32>
    %19 = vector.broadcast %18 : vector<2x8x1xf32> to vector<2x8x8xf32>
    %20 = arith.subf %16, %19 : vector<2x8x8xf32>
    %21 = math.exp %20 : vector<2x8x8xf32>
    %cst_19 = arith.constant dense<0.000000e+00> : vector<2x8xf32>
    %22 = vector.multi_reduction <add>, %21, %cst_19 [2] : vector<2x8x8xf32> to vector<2x8xf32>
    %23 = vector.shape_cast %22 : vector<2x8xf32> to vector<2x8x1xf32>
    %cst_20 = arith.constant 1.000000e+00 : f32
    %24 = vector.broadcast %cst_20 : f32 to vector<2x8x1xf32>
    %25 = arith.divf %24, %23 : vector<2x8x1xf32>
    %26 = vector.broadcast %25 : vector<2x8x1xf32> to vector<2x8x8xf32>
    %27 = arith.mulf %21, %26 : vector<2x8x8xf32>
    "tpu.trace_start"() <{level = 10 : i32, message = "gqk,gkd->gqd"}> : () -> ()
    %cst_21 = arith.constant dense<0.000000e+00> : vector<2x8x32xf32>
    %28 = tpu.matmul %27, %5, %cst_21 {dimension_numbers = #tpu.dot_dimension_numbers<[2], [1], [1], [2], [0, 0, 0, 1, 1, 2], [0], [0]>} : vector<2x8x8xf32>, vector<2x8x32xf32>, vector<2x8x32xf32> -> vector<2x8x32xf32>
    "tpu.trace_stop"() : () -> ()
    %c0_22 = arith.constant 0 : index
    %c0_23 = arith.constant 0 : index
    %c0_24 = arith.constant 0 : index
    %c0_25 = arith.constant 0 : index
    %29 = vector.load %arg8[%c0_22, %c0_23, %c0_24, %c0_25] : memref<1x2x8x8xf32, #tpu.memory_space<vmem>>, vector<1x2x8x8xf32>
    %30 = vector.shape_cast %29 : vector<1x2x8x8xf32> to vector<2x8x8xf32>
    %31 = vector.shape_cast %27 : vector<2x8x8xf32> to vector<1x2x8x8xf32>
    tpu.vector_store %arg8[%c0_22, %c0_23, %c0_24, %c0_25], %31 {strides = array<i32>} : memref<1x2x8x8xf32, #tpu.memory_space<vmem>>, vector<1x2x8x8xf32>,
    %c0_26 = arith.constant 0 : index
    %c0_27 = arith.constant 0 : index
    %c0_28 = arith.constant 0 : index
    %c0_29 = arith.constant 0 : index
    %32 = vector.load %arg7[%c0_26, %c0_27, %c0_28, %c0_29] : memref<1x2x8x32xf32, #tpu.memory_space<vmem>>, vector<1x2x8x32xf32>
    %33 = vector.shape_cast %32 : vector<1x2x8x32xf32> to vector<2x8x32xf32>
    %34 = vector.shape_cast %28 : vector<2x8x32xf32> to vector<1x2x8x32xf32>
    tpu.vector_store %arg7[%c0_26, %c0_27, %c0_28, %c0_29], %34 {strides = array<i32>} : memref<1x2x8x32xf32, #tpu.memory_space<vmem>>, vector<1x2x8x32xf32>,
    return
  }
  func.func @transform_0(%arg0: i32, %arg1: i32, %arg2: i32) -> (i32, i32, i32, i32) {
    %c0_i32 = arith.constant 0 : i32
    %c0_i32_0 = arith.constant 0 : i32
    return %arg0, %arg1, %arg2, %c0_i32 : i32, i32, i32, i32
  }
  func.func @transform_1(%arg0: i32, %arg1: i32, %arg2: i32) -> (i32, i32, i32, i32) {
    %c0_i32 = arith.constant 0 : i32
    %c0_i32_0 = arith.constant 0 : i32
    %c0_i32_1 = arith.constant 0 : i32
    return %arg0, %arg1, %c0_i32, %c0_i32_0 : i32, i32, i32, i32
  }
  func.func @transform_2(%arg0: i32, %arg1: i32, %arg2: i32) -> (i32, i32, i32, i32) {
    %c0_i32 = arith.constant 0 : i32
    %c0_i32_0 = arith.constant 0 : i32
    %c0_i32_1 = arith.constant 0 : i32
    return %arg0, %arg1, %c0_i32, %c0_i32_0 : i32, i32, i32, i32
  }
  func.func @transform_3(%arg0: i32, %arg1: i32, %arg2: i32) -> (i32, i32, i32, i32) {
    %c0_i32 = arith.constant 0 : i32
    %c0_i32_0 = arith.constant 0 : i32
    return %arg0, %arg1, %arg2, %c0_i32 : i32, i32, i32, i32
  }
  func.func @transform_4(%arg0: i32, %arg1: i32, %arg2: i32) -> (i32, i32, i32, i32) {
    %c0_i32 = arith.constant 0 : i32
    %c0_i32_0 = arith.constant 0 : i32
    return %arg0, %arg1, %arg2, %c0_i32 : i32, i32, i32, i32
  }
  func.func @transform_5(%arg0: i32, %arg1: i32, %arg2: i32) -> (i32, i32, i32, i32) {
    %c0_i32 = arith.constant 0 : i32
    %c0_i32_0 = arith.constant 0 : i32
    return %arg0, %arg1, %arg2, %c0_i32 : i32, i32, i32, i32
  }
}

</mosaic_0001>

<bundles_post_ra>
// kernel: tpu_custom_call.1
= control target key start
LH: loop header
LB: loop body
LE: loop exit
PB: predicated region body
PF: predicated region fallthrough
CT: control target
= control target key end

     0   :  { %s1369_s0 = inlined_call_operand.vmem [shape: f32[2,2,8,32], index: 0, kind: input, shape index: {}]   ;;  %s1370_s1 = inlined_call_operand.hbm [shape: f32[2,2,8,32], index: 1, kind: input, shape index: {}]   ;;  %s1371_s2 = inlined_call_operand.hbm [shape: f32[2,2,8,32], index: 2, kind: input, shape index: {}]   ;;  %s1372_s3 = inlined_call_operand.vmem [shape: s32[2,2,8,8], index: 3, kind: input, shape index: {}]   ;;  %s1373_s4 = inlined_call_operand.hbm [shape: f32[2,2,8,32], index: 4, kind: output, shape index: {0}]   ;;  %s1374_s5 = inlined_call_operand.hbm [shape: f32[2,2,8,8], index: 5, kind: output, shape index: {1}]  }
   0x1   :  { %1377 = sst [smem:[#allocation16_spill]] %s1370_s1 }
   0x2   :  { %11 = vsyncpa [#allocation3], 0 }
   0x3   :  { %13 = vsyncpa [#allocation3 + $0x1], 0 }
   0x4   :  { %14 = vsyncpa [#allocation6], 0 }
   0x5   :  { %16 = vsyncpa [#allocation6 + $0x1], 0 }
   0x6   :  { %17 = vsyncpa [#allocation4], 0 }
   0x7   :  { %19 = vsyncpa [#allocation4 + $0x1], 0 }
   0x8   :  { %20 = vsyncpa [#allocation9], 0 }
   0x9   :  { %22 = vsyncpa [#allocation9 + $0x1], 0  ;;  %s1176_s18 = smov 0   ;;  %s1178_s19 = smov 0  }
   0xa   :  { %s1180_s20 = smov 0   ;;  %s1182_s21 = smov 0  }
   0xb   :  { %s1184_s22 = smov 0   ;;  %s1186_s23 = smov 0  }
   0xc LB: > { %1378 = sst [smem:[#allocation14_spill]] %s1136_s22  ;;  %s839_s24 = sadd.s32 4294967295, %s1140_s23   ;;  %s1140_s23 = sphi %s1186_s23, %s28_s23   ;;  %s1136_s22 = sphi %s1184_s22, %s1387_s22   ;;  %s1132_s21 = sphi %s1182_s21, %s1386_s21   ;;  %s1128_s20 = sphi %s1180_s20, %s1390_s20   ;;  %s1124_s19 = sphi %s1178_s19, %s1389_s19   ;;  %s1120_s18 = sphi %s1176_s18, %s1388_s18  }
   0xd   : > { %s840_s25 = sadd.s32 4294967294, %s1140_s23   ;;  %s47_s26 = sadd.s32 1, %s1136_s22 }
   0xe   : > { %s86_s27 = sadd.s32 1, %s1128_s20  ;;  %p49_p0 = scmp.ge.s32.totalorder %s47_s26, 2 }
   0xf   : > { %p93_p1 = scmp.ne.s32.totalorder %s1128_s20, %s1124_s19  ;;  %p94_p2 = scmp.eq.s32.totalorder %s1140_s23, 0 }
  0x10   : > { %p99_p3 = scmp.ne.s32.totalorder %s1124_s19, %s1120_s18  ;;  %s1392_s26 = smov (%p49_p0, %s47_s26), 0 }
  0x11   : > { %1379 = sst [smem:[#allocation15_spill]] %s1392_s26  ;;  %p1217_p4 = por %p94_p2, %p93_p1 }
  0x12   : > { %p100_p5 = scmp.eq.s32.totalorder %s839_s24, 0  ;;  %s81_s29 = ssub.s32 %s1136_s22, %s1392_s26 }
  0x13   : > { %p185_p6 = scmp.eq.s32.totalorder %s839_s24, 1  ;;  %p84_p7 = scmp.eq.s32.totalorder %s81_s29, 0 }
  0x14   : > { %p1223_p8 = por %p100_p5, %p99_p3  ;;  %p191_p10 = scmp.eq.s32.totalorder %s840_s25, 1 }
  0x15   : > { %p1227_p9 = por %p185_p6, %p93_p1  ;;  %p842_p12 = scmp.ge.s32.totalorder %s1140_s23, 2 }
  0x16   : > { %s1232_s7 = scalar_select %p84_p7, %s1128_s20, %s86_s27  }
  0x17   : > { %p1234_p11 = por %p191_p10, %p99_p3  ;;  %p900_p13 = scmp.lt.s32.totalorder %s1140_s23, 2 }
  0x18   : > { %s1241_s9 = sand.u32 1, %s1128_s20   ;;  %s872_s11 = sshll.u32 %s1136_s22, 4 }
  0x19   : > { %s843_s10 = sshll.u32 %s1241_s9, 4  ;;  %s1384_s1 = sld [smem:[#allocation16_spill]] }
  0x1a   : > { %s261_s15 = scalar_lea.vmem [#allocation2], %s843_s10  ;;  %p1250_p0 = pnand %p900_p13, %p1217_p4 }
  0x1b   : > { %s271_s16 = sshll.u32 %s261_s15, 4  ;;  %p849_p1 = scmp.ge.s32.totalorder %s1140_s23, 1  ;;  %s272_s16 = int_to_ptr.vmem [resolvable:$true] %s271_s16 }
  0x1c   : > { %s258_s25 = scalar_lea.sflag [#allocation3], %s1241_s9  ;;  %s1142_s27 = smov 128  }
  0x1d   : > { %s1143_s29 = smov 8   ;;  %p319_p2 = scmp.lt.s32.totalorder %s1140_s23, 3 }
  0x1e   : > { %s285_s28 = scalar_lea.vmem [#allocation5], %s843_s10  ;;  %s282_s26 = scalar_lea.sflag [#allocation6], %s1241_s9 }
  0x1f   : > { %s268_s14 = scalar_lea.hbm %s1384_s1, %s872_s11  ;;  %p320_p3 = pnand %p849_p1, %p319_p2 }
  0x20   : > { %s269_s17 = sshll.u32 %s268_s14, 4  ;;  %s292_s14 = scalar_lea.hbm %s1371_s2, %s872_s11  ;;  %s270_s17 = int_to_ptr.hbm [resolvable:$true] %s269_s17 }
  0x21   : > { %889 = dma.hbm_to_vmem [thread:$0]  (!%p1250_p0), %s270_s17, 256, %s272_s16, %s258_s25, %s1142_s27, %s1142_s27, %s1143_s29  }
  0x22   : > { %s293_s15 = sshll.u32 %s292_s14, 4  ;;  %s295_s1 = sshll.u32 %s285_s28, 4  ;;  %s294_s15 = int_to_ptr.hbm [resolvable:$true] %s293_s15  ;;  %s296_s1 = int_to_ptr.vmem [resolvable:$true] %s295_s1 }
  0x23   : > { %892 = dma.hbm_to_vmem [thread:$0]  (!%p1250_p0), %s294_s15, 256, %s296_s1, %s282_s26, %s1142_s27, %s1142_s27, %s1143_s29  }
  0x24   : > { %323 = sbr.rel (%p320_p3) target bundleno = 587 (0x24b), region = 36  ;;  %s1266_s22 = sand.u32 (!%p320_p3), 1, %s1124_s19  }
  0x25   : > { %s1269_s16 = sshll.u32 (!%p320_p3), %s1266_s22, 4  ;;  %s326_s11 = scalar_lea.sflag (!%p320_p3), [#allocation3], %s1266_s22 }
  0x26   : > { %s329_s17 = scalar_lea.vmem (!%p320_p3), [#allocation2], %s1269_s16 }
  0x29   : > { %1103 = dma.done.wait (%p1223_p8), %s326_s11, 256  }
  0x2a   : > { %1105 = vsyncadd (%p1223_p8), %s326_s11, 4294967040  ;;  %s336_s1 = scalar_lea.sflag [#allocation6], %s1266_s22  ;;  %s339_s26 = scalar_lea.vmem [#allocation5], %s1269_s16 }
  0x2b   : > { %1107 = dma.done.wait (%p1223_p8), %s336_s1, 256  }
  0x2c   : > { %1109 = vsyncadd (%p1223_p8), %s336_s1, 4294967040  ;;  %p402_p4 = scmp.lt.s32.totalorder %s1132_s21, 1  ;;  %vm441_vm0 = vcmask 261120   ;;  %v433_v0 = vld [vmem:[%s329_s17] sm:$0xff]  ;;  %v434_v1 = vld [vmem:[%s329_s17 + $0x8] sm:$0xff]  ;;  %vm498_vm2 = vcmask 64512  }
  0x2d   : > { %858 = vmatpush.xpose.msk.msra.mxu0 %vm441_vm0, %v433_v0  ;;  %860 = vmatpush.xpose.msk.msra.mxu1 %vm441_vm0, %v434_v1  ;;  %v435_v24 = vld [vmem:[%s339_s26] sm:$0xff]  ;;  %v436_v25 = vld [vmem:[%s339_s26 + $0x8] sm:$0xff]  ;;  %s400_s13 = scalar_lea.vmem [#allocation8], %s1269_s16  ;;  %s876_s14 = sshll.u32 %s1132_s21, 4 }
  0x2e   : > { %s403_s9 = scalar_select %p402_p4, %s1132_s21, 1  ;;  %567 = vmatpush.msra.mxu2 %v435_v24  ;;  %590 = vmatpush.msra.mxu3 %v436_v25 }
  0x2f   : > { %s640_s15 = sshll.u32 %s400_s13, 4  ;;  %s639_s17 = scalar_lea.hbm %s1374_s5, %s876_s14  ;;  %s641_s15 = int_to_ptr.vmem [resolvable:$true] %s640_s15 }
  0x30   : > { %s874_s10 = sshll.u32 %s403_s9, 4  ;;  %s642_s1 = sshll.u32 %s639_s17, 4  ;;  %s643_s1 = int_to_ptr.hbm [resolvable:$true] %s642_s1 }
  0x31   : > { %s412_s27 = scalar_lea.vmem %s1369_s0, %s874_s10  ;;  %s427_s12 = scalar_lea.vmem %s1372_s3, %s874_s10 }
  0x32   : > { %v431_v2 = vld [vmem:[%s412_s27] sm:$0xff]  ;;  %v432_v3 = vld [vmem:[%s412_s27 + $0x8] sm:$0xff]  ;;  %s605_s26 = scalar_lea.sflag [#allocation9], %s1266_s22  ;;  %s1036_s9 = sshra.s32 %s643_s1, 4  ;;  %s1037_s9 = int_to_ptr.hbm [resolvable:$true] %s1036_s9 }
  0x33   : > { %859 = vmatmul.msk.f32.vlgmr.msra.gmra.mxu0 %vm441_vm0, %v431_v2  ;;  %861 = vmatmul.msk.f32.vlgmr.msra.gmra.mxu1 %vm441_vm0, %v432_v3  ;;  %v437_v4 = vld [vmem:[%s427_s12] sm:$0xff]  ;;  %v438_v8 = vld [vmem:[%s427_s12 + $0x8] sm:$0xff]  ;;  %s1038_s10 = scalar_lea.hbm %s1037_s9, 16  ;;  %s1042_s21 = scalar_lea.hbm %s1374_s5, 32 }
  0x34   : > { %vm439_vm1 = vcmp.ne.s32.totalorder %v437_v4, 0  ;;  %vm440_vm3 = vcmp.ne.s32.totalorder %v438_v8, 0  ;;  %p1039_p5 = scmp.ne.s32.totalorder %s1037_s9, %s1038_s10  ;;  %p1043_p8 = scmp.lt.s32.totalorder %s1037_s9, %s1374_s5 }
  0x35   : > { %p1044_p10 = scmp.lt.s32.totalorder %s1042_s21, %s1038_s10 }
  0x36   : > { %p1040_p6 = pnand %p1039_p5, %p1227_p9 }
  0x37   : > { %p1045_p13 = por %p1044_p10, %p1043_p8 }
  0x38   : > { %p1041_p7 = pneg %p1040_p6 }
  0x3a   : > { %p1046_p0 = pnand %p1045_p13, %p1041_p7 }
  0xb0   : > { %v465_v5 = vpop.f32.mrf.mxu0  ;;  %v491_v6 = vpop.f32.mrf.mxu1 }
  0xb1   : > { %v494_v7 = vmul.f32 0.17677669, %v465_v5  ;;  %v495_v10 = vmul.f32 0.17677669, %v491_v6 }
  0xb3   : > { %v496_v9 = vsel %vm439_vm1, -1e+09, %v494_v7  ;;  %v497_v12 = vsel %vm440_vm3, -1e+09, %v495_v10 }
  0xb4   : > { %v499_v11 = vsel %vm498_vm2, %v496_v9, -inf  ;;  %v502_v13 = vsel %vm498_vm2, %v497_v12, -inf }
  0xb5   : > { %500 = vmax.xlane.f32.xlu0 %v499_v11 }
  0xbd   : > { %503 = vmax.xlane.f32.xlu0 %v502_v13 }
 0x128   : > { %v501_v14 = vpop.xlane.xlu0 %500 }
 0x129   : > { %v505_v15 = vsub.f32 %v496_v9, %v501_v14 }
 0x12b   : > { %v507_v16 = vmul.f32 1.442695, %v505_v15 }
 0x12d   : > { %954 = vpow2.f32 %v507_v16 }
 0x130   : > { %v504_v17 = vpop.xlane.xlu0 %503 }
 0x131   : > { %v506_v18 = vsub.f32 %v497_v12, %v504_v17 }
 0x133   : > { %v955_v19 = vpop.eup %954  ;;  %v509_v20 = vmul.f32 1.442695, %v506_v18 }
 0x134   : > { %v511_v21 = vsel %vm498_vm2, %v955_v19, 0.0 }
 0x135   : > { %956 = vpow2.f32 %v509_v20  ;;  %512 = vadd.xlane.f32.xlu1 %v511_v21 }
 0x13b   : > { %v957_v22 = vpop.eup %956 }
 0x13c   : > { %v514_v23 = vsel %vm498_vm2, %v957_v22, 0.0 }
 0x13d   : > { %515 = vadd.xlane.f32.xlu1 %v514_v23 }
 0x1a8   : > { %v513_v26 = vpop.xlane.xlu1 %512 }
 0x1a9   : > { %958 = vrcp.f32 %v513_v26  ;;  %v528_v31 = vand.u32 2147483648, %v513_v26  ;;  %v526_v33 = vand.u32 2147483647, %v513_v26  ;;  %vm522_vm5 = vweird.f32 %v513_v26 }
 0x1ab   : > { %v529_v36 = vor.u32 1.1754944e-38, %v528_v31  ;;  %vm527_vm7 = vcmp.eq.f32.partialorder %v526_v33, 8.507059e+37 }
 0x1af   : > { %v959_v27 = vpop.eup %958 }
 0x1b0   : > { %v518_v28 = vmul.f32 %v959_v27, %v513_v26  ;;  %v516_v29 = vpop.xlane.xlu1 %515  ;;  %vm523_vm4 = vweird.f32 %v959_v27 }
 0x1b1   : > { %960 = vrcp.f32 %v516_v29  ;;  %vm524_vm6 = vmor %vm522_vm5, %vm523_vm4  ;;  %v543_v42 = vand.u32 2147483648, %v516_v29  ;;  %v541_v44 = vand.u32 2147483647, %v516_v29  ;;  %vm537_vm9 = vweird.f32 %v516_v29 }
 0x1b2   : > { %v519_v30 = vsub.f32 1.0, %v518_v28 }
 0x1b3   : > { %v544_v46 = vor.u32 1.1754944e-38, %v543_v42  ;;  %vm542_vm11 = vcmp.eq.f32.partialorder %v541_v44, 8.507059e+37 }
 0x1b4   : > { %v520_v32 = vmul.f32 %v959_v27, %v519_v30 }
 0x1b6   : > { %v521_v34 = vadd.f32 %v959_v27, %v520_v32 }
 0x1b7   : > { %v961_v35 = vpop.eup %960 }
 0x1b8   : > { %v533_v37 = vmul.f32 %v961_v35, %v516_v29  ;;  %v525_v38 = vsel %vm524_vm6, %v959_v27, %v521_v34  ;;  %vm538_vm8 = vweird.f32 %v961_v35 }
 0x1b9   : > { %v530_v39 = vsel %vm527_vm7, %v529_v36, %v525_v38  ;;  %vm539_vm10 = vmor %vm537_vm9, %vm538_vm8 }
 0x1ba   : > { %v534_v40 = vsub.f32 1.0, %v533_v37  ;;  %v547_v41 = vmul.f32 %v955_v19, %v530_v39 }
 0x1bc   : > { %v535_v43 = vmul.f32 %v961_v35, %v534_v40  ;;  %862 = vmatmul.msk.f32.vlgmr.msra.gmra.mxu2 %vm498_vm2, %v547_v41  ;;  %595 = vst.msk [vmem:[%s400_s13] sm:$0xff] %vm498_vm2, %v547_v41 }
 0x1be   : > { %v536_v45 = vadd.f32 %v961_v35, %v535_v43 }
 0x1c0   : > { %v540_v47 = vsel %vm539_vm10, %v961_v35, %v536_v45 }
 0x1c1   : > { %v545_v48 = vsel %vm542_vm11, %v544_v46, %v540_v47 }
 0x1c2   : > { %v548_v49 = vmul.f32 %v957_v22, %v545_v48 }
 0x1c4   : > { %863 = vmatmul.msk.f32.vlgmr.msra.gmra.mxu3 %vm498_vm2, %v548_v49  ;;  %596 = vst.msk [vmem:[%s400_s13 + $0x8] sm:$0xff] %vm498_vm2, %v548_v49 }
 0x1c5   : > { %1049 = shalt.err (!%p1046_p0)
}
 0x1c6   : > { %s1144_s29 = smov 128   ;;  %s1145_s12 = smov 8  }
 0x1c7   : > { %883 = dma.vmem_to_hbm [thread:$0]  (%p1227_p9), %s641_s15, 256, %s643_s1, %s605_s26, %s1144_s29, %s1144_s29, %s1145_s12  }
 0x1c8   : > { %s393_s13 = scalar_lea.vmem [#allocation7], %s1269_s16  ;;  %s619_s17 = scalar_lea.hbm %s1373_s4, %s876_s14 }
 0x1c9   : > { %s620_s9 = sshll.u32 %s393_s13, 4  ;;  %s622_s10 = sshll.u32 %s619_s17, 4  ;;  %s621_s9 = int_to_ptr.vmem [resolvable:$true] %s620_s9  ;;  %s623_s10 = int_to_ptr.hbm [resolvable:$true] %s622_s10 }
 0x1ca   : > { %s600_s24 = scalar_lea.sflag [#allocation4], %s1266_s22  ;;  %s1064_s25 = sshra.s32 %s623_s10, 4  ;;  %s1065_s25 = int_to_ptr.hbm [resolvable:$true] %s1064_s25 }
 0x1cb   : > { %s1066_s15 = scalar_lea.hbm %s1065_s25, 16  ;;  %s1070_s26 = scalar_lea.hbm %s1373_s4, 32 }
 0x1cc   : > { %p1067_p1 = scmp.ne.s32.totalorder %s1065_s25, %s1066_s15  ;;  %p1071_p4 = scmp.lt.s32.totalorder %s1065_s25, %s1373_s4 }
 0x1cd   : > { %p1072_p5 = scmp.lt.s32.totalorder %s1070_s26, %s1066_s15 }
 0x1ce   : > { %p1068_p2 = pnand %p1067_p1, %p1227_p9 }
 0x1cf   : > { %p1073_p6 = por %p1072_p5, %p1071_p4 }
 0x1d0   : > { %p1069_p3 = pneg %p1068_p2 }
 0x1d2   : > { %p1074_p7 = pnand %p1073_p6, %p1069_p3 }
 0x23f   : > { %v569_v50 = vpop.f32.mrf.mxu2 }
 0x240   : > { %597 = vst.msk [vmem:[%s393_s13] sm:$0xff] %vm441_vm0, %v569_v50 }
 0x247   : > { %v592_v51 = vpop.f32.mrf.mxu3 }
 0x248   : > { %598 = vst.msk [vmem:[%s393_s13 + $0x8] sm:$0xff] %vm441_vm0, %v592_v51 }
 0x249   : > { %1077 = shalt.err (!%p1074_p7)
}
 0x24a   : > { %882 = dma.vmem_to_hbm [thread:$0]  (%p1227_p9), %s621_s9, 256, %s623_s10, %s600_s24, %s1144_s29, %s1144_s29, %s1145_s12  }
 0x24b PF: > { %s657_s22 = sand.u32 1, %s1120_s18   ;;  %p894_p8 = pnand %p842_p12, %p1234_p11 }
 0x24c   : > { %s658_s27 = scalar_lea.sflag [#allocation4], %s657_s22 }
 0x24d   : > { %p895_p10 = pneg %p894_p8 }
 0x24f   : > { %1111 = dma.done.wait (%p895_p10), %s658_s27, 256  }
 0x250   : > { %1113 = vsyncadd (%p895_p10), %s658_s27, 4294967040  ;;  %s668_s30 = scalar_lea.sflag [#allocation9], %s657_s22 }
 0x251   : > { %1115 = dma.done.wait (%p895_p10), %s668_s30, 256  }
 0x252   : > { %1117 = vsyncadd (%p895_p10), %s668_s30, 4294967040  ;;  %s28_s23 = sadd.s32 1, %s1140_s23   ;;  %s1386_s21 = sld [smem:[#allocation14_spill]] }
 0x253   : > { %p25_p13 = scmp.ge.s32.totalorder %s28_s23, 4   ;;  %s1387_s22 = sld [smem:[#allocation15_spill]] }
 0x254   : > { %s1388_s18 = smov %s1124_s19  ;;  %s1389_s19 = smov %s1128_s20 }
 0x255   : > { %s1390_s20 = smov %s1232_s7  ;;  %27 = sbr.rel (!%p25_p13) target bundleno = 12 (0xc), region = 117 }
 0x25a   :  { %674 = vsyncpa [#allocation3], 1 }
 0x25b   :  { %676 = vsyncpa [#allocation3 + $0x1], 1 }
 0x25c   :  { %677 = vsyncpa [#allocation6], 1 }
 0x25d   :  { %679 = vsyncpa [#allocation6 + $0x1], 1 }
 0x25e   :  { %680 = vsyncpa [#allocation4], 1 }
 0x25f   :  { %682 = vsyncpa [#allocation4 + $0x1], 1 }
 0x260   :  { %683 = vsyncpa [#allocation9], 1 }
 0x261   :  { %685 = vsyncpa [#allocation9 + $0x1], 1 }

</bundles_post_ra>
